<compile_context>
chip_gen: v7x
topology: tpu7x:2x2x1
jax: 0.10.0
libtpu: 0.0.40
codegen_flags: <defaults>
</compile_context>

<pallas_src>
import numpy as np
import jax
import jax.numpy as jnp
from jax.experimental import pallas as pl
from jax.experimental.pallas import tpu as pltpu


# ---------------------------------------------------------------------------
# setup helpers (plain JAX "glue", mirrors the module __init__)
# ---------------------------------------------------------------------------
def positional_encoding(layer_idx, dim=8):
    """Layer-index positional encoding (same formula as the torch module)."""
    i = np.arange(dim // 2)
    angle_rates = 1.0 / np.power(10000, 2 * i / dim)
    enc = np.concatenate([np.sin(layer_idx * angle_rates),
                          np.cos(layer_idx * angle_rates)])
    return enc.astype(np.float32)


def magnitude_prune(weight, prune_ratio):
    """weight * (|weight| > quantile(|weight|, prune_ratio)) — per tensor."""
    if prune_ratio <= 0.0:
        return weight
    a = jnp.abs(weight)
    thr = jnp.quantile(a.reshape(-1), prune_ratio)
    return weight * (a > thr)


def prune_stacked(w, prune_ratio):
    """Prune each expert's tensor independently (leading axis = expert)."""
    return jnp.stack([magnitude_prune(w[e], prune_ratio)
                      for e in range(w.shape[0])], axis=0)


def _gelu_tanh(x):
    # tanh-approximation GELU (tanh goes to the EUP slot)
    return 0.5 * x * (1.0 + jnp.tanh(0.7978845608028654 * (x + 0.044715 * x * x * x)))


# ---------------------------------------------------------------------------
# fused Pallas kernel: merged-expert MLP on a token tile
# ---------------------------------------------------------------------------
def _make_kernel(E, H, H4):
    def kernel(x_ref, g_ref, w1_ref, b1_ref, dw1_ref, db1_ref,
               w2_ref, b2_ref, dw2_ref, db2_ref, o_ref):
        x = x_ref[...]                                   # (TM, H)  bf16
        g = g_ref[...]                                   # (TM, E)  f32
        gb = g.astype(jnp.bfloat16)

        # ---- layer 1: x @ (w1 + sum_e g_e dw1_e) + (b1 + g @ db1) ---------
        h_pre = jnp.dot(x, w1_ref[...],
                        preferred_element_type=jnp.float32)          # (TM, H4)
        # scaled-input factorization: one fat matmul, f32-accumulated on MXU
        x_sc = jnp.concatenate([gb[:, e:e + 1] * x for e in range(E)],
                               axis=-1)                               # (TM, E*H) bf16
        h_pre = h_pre + jnp.dot(x_sc, dw1_ref[...],
                                preferred_element_type=jnp.float32)
        h_pre = h_pre + b1_ref[...] + jnp.dot(
            g, db1_ref[...], preferred_element_type=jnp.float32)      # bias merge (MXU)
        h = _gelu_tanh(h_pre)                                         # (TM, H4) f32

        # ---- layer 2: h @ (w2 + sum_e g_e dw2_e) + (b2 + g @ db2) ---------
        hb = h.astype(jnp.bfloat16)
        acc = jnp.dot(hb, w2_ref[...],
                      preferred_element_type=jnp.float32)             # (TM, H)
        for e in range(E):                                            # static -> unrolled
            he = (g[:, e:e + 1] * h).astype(jnp.bfloat16)             # (TM, H4)
            acc = acc + jnp.dot(he, dw2_ref[e],
                                preferred_element_type=jnp.float32)
        acc = acc + b2_ref[...] + jnp.dot(
            g, db2_ref[...], preferred_element_type=jnp.float32)
        o_ref[...] = acc.astype(o_ref.dtype)
    return kernel


def _pick_token_tile(T):
    for tm in (512, 256, 128, 64, 32, 16):
        if T % tm == 0:
            return tm
    return T


# ---------------------------------------------------------------------------
# wrapper
# ---------------------------------------------------------------------------
def sparse_we_moe_forward(x, pos_enc, gate_params, base_params, tv_params):
    B, S, H = x.shape
    P = pos_enc.shape[0]
    wg1, bg1, wg2, bg2 = gate_params
    w1, b1, w2, b2 = base_params
    dw1, db1, dw2, db2 = tv_params
    E = wg2.shape[1]
    H4 = w1.shape[1]
    T = B * S

    # ---- shared gate (tiny: (B, E) numbers) — computed outside the kernel --
    # Positional-encoding contribution folded into a bias so the (B,S,H+P)
    # concat is never materialised; mean over seq (batch_first=True).
    pe_bias = pos_enc @ wg1[:P, :] + bg1                  # (Din,)
    hg = jnp.maximum(jnp.einsum('bsh,hd->bsd', x, wg1[P:, :]) + pe_bias, 0.0)
    logits = hg @ wg2 + bg2                               # (B, S, E)
    gw = logits.mean(axis=1)                              # (B, E)
    g_tok = jnp.repeat(gw, S, axis=0).astype(jnp.float32)  # (T, E), per-token routing

    # ---- factorized task-vector operands for the MXU (bf16, f32 accum) -----
    dw1_2d = dw1.reshape(E * H, H4).astype(jnp.bfloat16)  # rows e-major: [e, h_in]
    dw2_3d = dw2.astype(jnp.bfloat16)                     # (E, H4, H)
    w1b = w1.astype(jnp.bfloat16)
    w2b = w2.astype(jnp.bfloat16)
    xf = x.reshape(T, H).astype(jnp.bfloat16)             # token slab, bf16

    TM = _pick_token_tile(T)
    grid = (T // TM,)

    def const2d(shape):
        return pl.BlockSpec(shape, lambda t: (0, 0))

    out = pl.pallas_call(
        _make_kernel(E, H, H4),
        out_shape=jax.ShapeDtypeStruct((T, H), x.dtype),
        grid=grid,
        in_specs=[
            pl.BlockSpec((TM, H), lambda t: (t, 0)),      # x tile (bf16)
            pl.BlockSpec((TM, E), lambda t: (t, 0)),      # routing weights per token
            const2d((H, H4)),                             # w1  (bf16)  — VMEM-resident
            const2d((1, H4)),                             # b1
            const2d((E * H, H4)),                         # dw1_2d (bf16)
            const2d((E, H4)),                             # db1
            const2d((H4, H)),                             # w2  (bf16)
            const2d((1, H)),                              # b2
            pl.BlockSpec((E, H4, H), lambda t: (0, 0, 0)),  # dw2 (bf16)
            const2d((E, H)),                              # db2
        ],
        out_specs=pl.BlockSpec((TM, H), lambda t: (t, 0)),
        compiler_params=pltpu.CompilerParams(
            # token axis is data-parallel -> shards across v7x's 2 TensorCores
            dimension_semantics=("parallel",),
            vmem_limit_bytes=64 * 1024 * 1024),
    )(xf, g_tok, w1b, b1[None, :], dw1_2d, db1,
      w2b, b2[None, :], dw2_3d, db2)
    return out.reshape(B, S, H)


# ---------------------------------------------------------------------------
# pure-JAX reference (mirrors the torch forward for this configuration, f32)
# ---------------------------------------------------------------------------
def reference_forward(x, pos_enc, gate_params, base_params, tv_params):
    B, S, H = x.shape
    P = pos_enc.shape[0]
    wg1, bg1, wg2, bg2 = gate_params
    w1, b1, w2, b2 = base_params
    dw1, db1, dw2, db2 = tv_params

    pe = jnp.broadcast_to(pos_enc[None, None, :], (B, S, P))
    xg = jnp.concatenate([pe, x], axis=-1)
    h = jnp.maximum(xg @ wg1 + bg1, 0.0)
    logits = h @ wg2 + bg2                                 # (B, S, E)
    gw = logits.mean(axis=1)                               # batch_first -> mean over seq

    outs = []
    for b in range(B):                                     # batch_reduce=False path
        g = gw[b]
        w1m = w1 + jnp.tensordot(g, dw1, axes=1)
        b1m = b1 + g @ db1
        w2m = w2 + jnp.tensordot(g, dw2, axes=1)
        b2m = b2 + g @ db2
        hh = _gelu_tanh(x[b] @ w1m + b1m)
        outs.append(hh @ w2m + b2m)
    return jnp.stack(outs, axis=0)


# ---------------------------------------------------------------------------
if __name__ == "__main__":
    B, S, H, E = 2, 8, 32, 4          # batch, seq, hidden, num experts
    H4 = 4 * H
    P = 8                             # position_encoding_dim
    layer_idx = 3
    tv_prune_ratio = 0.5
    init_lambda = 0.2
    Din = H + P

    key = jax.random.PRNGKey(0)
    ks = jax.random.split(key, 16)

    # shared gate: Linear(Din, Din) -> ReLU -> Linear(Din, E); last bias = init_lambda
    wg1 = 0.05 * jax.random.normal(ks[0], (Din, Din), jnp.float32)
    bg1 = 0.05 * jax.random.normal(ks[1], (Din,), jnp.float32)
    wg2 = 0.01 * jax.random.normal(ks[2], (Din, E), jnp.float32)
    bg2 = jnp.full((E,), init_lambda, jnp.float32)
    gate_params = (wg1, bg1, wg2, bg2)

    # base model MLP (requires_grad_(False) in torch -> fixed weights here)
    w1 = 0.05 * jax.random.normal(ks[3], (H, H4), jnp.float32)
    b1 = 0.05 * jax.random.normal(ks[4], (H4,), jnp.float32)
    w2 = 0.05 * jax.random.normal(ks[5], (H4, H), jnp.float32)
    b2 = 0.05 * jax.random.normal(ks[6], (H,), jnp.float32)
    base_params = (w1, b1, w2, b2)

    # task vectors = expert - base, then per-tensor magnitude pruning
    dw1 = prune_stacked(0.05 * jax.random.normal(ks[7], (E, H, H4), jnp.float32), tv_prune_ratio)
    db1 = prune_stacked(0.05 * jax.random.normal(ks[8], (E, H4), jnp.float32), tv_prune_ratio)
    dw2 = prune_stacked(0.05 * jax.random.normal(ks[9], (E, H4, H), jnp.float32), tv_prune_ratio)
    db2 = prune_stacked(0.05 * jax.random.normal(ks[10], (E, H), jnp.float32), tv_prune_ratio)
    tv_params = (dw1, db1, dw2, db2)

    pos_enc = jnp.asarray(positional_encoding(layer_idx, P), jnp.float32)

    # hidden_states, layout (B, S, H) = batch_first
    x = jax.random.normal(ks[11], (B, S, H), jnp.float32)

    out = sparse_we_moe_forward(x, pos_enc, gate_params, base_params, tv_params)
    out = jax.block_until_ready(out)

    ref = reference_forward(x, pos_enc, gate_params, base_params, tv_params)
    err = float(jnp.max(jnp.abs(out - ref)))
    assert out.shape == (B, S, H)
    # bf16 MXU operands (f32 accumulation) -> loosened tolerance vs f32 reference
    assert err < 3e-2, f"max abs error {err}"

    print("KERNEL_OK")
</pallas_src>

<mosaic_0001>
module attributes {stable_mosaic.version = 11 : i64} {
  func.func @kernel(%arg0: i32, %arg1: memref<16x32xbf16, #tpu.memory_space<vmem>>, %arg2: memref<16x4xf32, #tpu.memory_space<vmem>>, %arg3: memref<32x128xbf16, #tpu.memory_space<vmem>>, %arg4: memref<1x128xf32, #tpu.memory_space<vmem>>, %arg5: memref<128x128xbf16, #tpu.memory_space<vmem>>, %arg6: memref<4x128xf32, #tpu.memory_space<vmem>>, %arg7: memref<128x32xbf16, #tpu.memory_space<vmem>>, %arg8: memref<1x32xf32, #tpu.memory_space<vmem>>, %arg9: memref<4x128x32xbf16, #tpu.memory_space<vmem>>, %arg10: memref<4x32xf32, #tpu.memory_space<vmem>>, %arg11: memref<16x32xf32, #tpu.memory_space<vmem>>) attributes {dimension_semantics = [#tpu.dimension_semantics<parallel>], iteration_bounds = array<i64: 1>, scalar_prefetch = 0 : i64, scratch_operands = 0 : i64, tpu.core_type = #tpu.core_type<tc>, window_params = [{transform_indices = @transform_0, window_bounds = array<i64: 16, 32>}, {transform_indices = @transform_1, window_bounds = array<i64: 16, 4>}, {pipeline_mode = #tpu.pipeline_mode<synchronous>, transform_indices = @transform_2, window_bounds = array<i64: 32, 128>}, {pipeline_mode = #tpu.pipeline_mode<synchronous>, transform_indices = @transform_3, window_bounds = array<i64: 1, 128>}, {pipeline_mode = #tpu.pipeline_mode<synchronous>, transform_indices = @transform_4, window_bounds = array<i64: 128, 128>}, {pipeline_mode = #tpu.pipeline_mode<synchronous>, transform_indices = @transform_5, window_bounds = array<i64: 4, 128>}, {pipeline_mode = #tpu.pipeline_mode<synchronous>, transform_indices = @transform_6, window_bounds = array<i64: 128, 32>}, {pipeline_mode = #tpu.pipeline_mode<synchronous>, transform_indices = @transform_7, window_bounds = array<i64: 1, 32>}, {pipeline_mode = #tpu.pipeline_mode<synchronous>, transform_indices = @transform_8, window_bounds = array<i64: 4, 128, 32>}, {pipeline_mode = #tpu.pipeline_mode<synchronous>, transform_indices = @transform_9, window_bounds = array<i64: 4, 32>}, {transform_indices = @transform_10, window_bounds = array<i64: 16, 32>}]} {
    %c0 = arith.constant 0 : index
    %c0_0 = arith.constant 0 : index
    %0 = vector.load %arg1[%c0, %c0_0] : memref<16x32xbf16, #tpu.memory_space<vmem>>, vector<16x32xbf16>
    %c0_1 = arith.constant 0 : index
    %c0_2 = arith.constant 0 : index
    %1 = vector.load %arg2[%c0_1, %c0_2] : memref<16x4xf32, #tpu.memory_space<vmem>>, vector<16x4xf32>
    %2 = arith.truncf %1 : vector<16x4xf32> to vector<16x4xbf16>
    %c0_3 = arith.constant 0 : index
    %c0_4 = arith.constant 0 : index
    %3 = vector.load %arg3[%c0_3, %c0_4] : memref<32x128xbf16, #tpu.memory_space<vmem>>, vector<32x128xbf16>
    %cst = arith.constant dense<0.000000e+00> : vector<16x128xf32>
    %4 = tpu.matmul %0, %3, %cst {dimension_numbers = #tpu.dot_dimension_numbers<[1], [0], [0], [1], [0, 0, 1, 1], [], []>} : vector<16x32xbf16>, vector<32x128xbf16>, vector<16x128xf32> -> vector<16x128xf32>
    %5 = vector.extract_strided_slice %2 {offsets = [0, 0], sizes = [16, 1], strides = [1, 1]} : vector<16x4xbf16> to vector<16x1xbf16>
    %6 = vector.broadcast %5 : vector<16x1xbf16> to vector<16x32xbf16>
    %7 = arith.mulf %6, %0 : vector<16x32xbf16>
    %8 = vector.extract_strided_slice %2 {offsets = [0, 1], sizes = [16, 1], strides = [1, 1]} : vector<16x4xbf16> to vector<16x1xbf16>
    %9 = vector.broadcast %8 : vector<16x1xbf16> to vector<16x32xbf16>
    %10 = arith.mulf %9, %0 : vector<16x32xbf16>
    %11 = vector.extract_strided_slice %2 {offsets = [0, 2], sizes = [16, 1], strides = [1, 1]} : vector<16x4xbf16> to vector<16x1xbf16>
    %12 = vector.broadcast %11 : vector<16x1xbf16> to vector<16x32xbf16>
    %13 = arith.mulf %12, %0 : vector<16x32xbf16>
    %14 = vector.extract_strided_slice %2 {offsets = [0, 3], sizes = [16, 1], strides = [1, 1]} : vector<16x4xbf16> to vector<16x1xbf16>
    %15 = vector.broadcast %14 : vector<16x1xbf16> to vector<16x32xbf16>
    %16 = arith.mulf %15, %0 : vector<16x32xbf16>
    %17 = tpu.concatenate %7, %10, %13, %16 in 1 : vector<16x32xbf16>, vector<16x32xbf16>, vector<16x32xbf16>, vector<16x32xbf16> -> vector<16x128xbf16>
    %c0_5 = arith.constant 0 : index
    %c0_6 = arith.constant 0 : index
    %18 = vector.load %arg5[%c0_5, %c0_6] : memref<128x128xbf16, #tpu.memory_space<vmem>>, vector<128x128xbf16>
    %cst_7 = arith.constant dense<0.000000e+00> : vector<16x128xf32>
    %19 = tpu.matmul %17, %18, %cst_7 {dimension_numbers = #tpu.dot_dimension_numbers<[1], [0], [0], [1], [0, 0, 1, 1], [], []>} : vector<16x128xbf16>, vector<128x128xbf16>, vector<16x128xf32> -> vector<16x128xf32>
    %20 = arith.addf %4, %19 : vector<16x128xf32>
    %c0_8 = arith.constant 0 : index
    %c0_9 = arith.constant 0 : index
    %21 = vector.load %arg4[%c0_8, %c0_9] : memref<1x128xf32, #tpu.memory_space<vmem>>, vector<1x128xf32>
    %22 = vector.broadcast %21 : vector<1x128xf32> to vector<16x128xf32>
    %23 = arith.addf %20, %22 : vector<16x128xf32>
    %c0_10 = arith.constant 0 : index
    %c0_11 = arith.constant 0 : index
    %24 = vector.load %arg6[%c0_10, %c0_11] : memref<4x128xf32, #tpu.memory_space<vmem>>, vector<4x128xf32>
    %cst_12 = arith.constant dense<0.000000e+00> : vector<16x128xf32>
    %25 = tpu.matmul %1, %24, %cst_12 {dimension_numbers = #tpu.dot_dimension_numbers<[1], [0], [0], [1], [0, 0, 1, 1], [], []>} : vector<16x4xf32>, vector<4x128xf32>, vector<16x128xf32> -> vector<16x128xf32>
    %26 = arith.addf %23, %25 : vector<16x128xf32>
    %cst_13 = arith.constant 5.000000e-01 : f32
    %27 = vector.broadcast %cst_13 : f32 to vector<16x128xf32>
    %28 = arith.mulf %27, %26 : vector<16x128xf32>
    %cst_14 = arith.constant 4.471500e-02 : f32
    %29 = vector.broadcast %cst_14 : f32 to vector<16x128xf32>
    %30 = arith.mulf %29, %26 : vector<16x128xf32>
    %31 = arith.mulf %30, %26 : vector<16x128xf32>
    %32 = arith.mulf %31, %26 : vector<16x128xf32>
    %33 = arith.addf %26, %32 : vector<16x128xf32>
    %cst_15 = arith.constant 0.797884583 : f32
    %34 = vector.broadcast %cst_15 : f32 to vector<16x128xf32>
    %35 = arith.mulf %34, %33 : vector<16x128xf32>
    %36 = math.tanh %35 : vector<16x128xf32>
    %cst_16 = arith.constant 1.000000e+00 : f32
    %37 = vector.broadcast %cst_16 : f32 to vector<16x128xf32>
    %38 = arith.addf %37, %36 : vector<16x128xf32>
    %39 = arith.mulf %28, %38 : vector<16x128xf32>
    %40 = arith.truncf %39 : vector<16x128xf32> to vector<16x128xbf16>
    %c0_17 = arith.constant 0 : index
    %c0_18 = arith.constant 0 : index
    %41 = vector.load %arg7[%c0_17, %c0_18] : memref<128x32xbf16, #tpu.memory_space<vmem>>, vector<128x32xbf16>
    %cst_19 = arith.constant dense<0.000000e+00> : vector<16x32xf32>
    %42 = tpu.matmul %40, %41, %cst_19 {dimension_numbers = #tpu.dot_dimension_numbers<[1], [0], [0], [1], [0, 0, 1, 1], [], []>} : vector<16x128xbf16>, vector<128x32xbf16>, vector<16x32xf32> -> vector<16x32xf32>
    %43 = vector.extract_strided_slice %1 {offsets = [0, 0], sizes = [16, 1], strides = [1, 1]} : vector<16x4xf32> to vector<16x1xf32>
    %44 = vector.broadcast %43 : vector<16x1xf32> to vector<16x128xf32>
    %45 = arith.mulf %44, %39 : vector<16x128xf32>
    %46 = arith.truncf %45 : vector<16x128xf32> to vector<16x128xbf16>
    %c0_20 = arith.constant 0 : index
    %c0_21 = arith.constant 0 : index
    %c0_22 = arith.constant 0 : index
    %47 = vector.load %arg9[%c0_20, %c0_21, %c0_22] : memref<4x128x32xbf16, #tpu.memory_space<vmem>>, vector<1x128x32xbf16>
    %48 = vector.shape_cast %47 : vector<1x128x32xbf16> to vector<128x32xbf16>
    %cst_23 = arith.constant dense<0.000000e+00> : vector<16x32xf32>
    %49 = tpu.matmul %46, %48, %cst_23 {dimension_numbers = #tpu.dot_dimension_numbers<[1], [0], [0], [1], [0, 0, 1, 1], [], []>} : vector<16x128xbf16>, vector<128x32xbf16>, vector<16x32xf32> -> vector<16x32xf32>
    %50 = arith.addf %42, %49 : vector<16x32xf32>
    %51 = vector.extract_strided_slice %1 {offsets = [0, 1], sizes = [16, 1], strides = [1, 1]} : vector<16x4xf32> to vector<16x1xf32>
    %52 = vector.broadcast %51 : vector<16x1xf32> to vector<16x128xf32>
    %53 = arith.mulf %52, %39 : vector<16x128xf32>
    %54 = arith.truncf %53 : vector<16x128xf32> to vector<16x128xbf16>
    %c1 = arith.constant 1 : index
    %c0_24 = arith.constant 0 : index
    %c0_25 = arith.constant 0 : index
    %55 = vector.load %arg9[%c1, %c0_24, %c0_25] : memref<4x128x32xbf16, #tpu.memory_space<vmem>>, vector<1x128x32xbf16>
    %56 = vector.shape_cast %55 : vector<1x128x32xbf16> to vector<128x32xbf16>
    %cst_26 = arith.constant dense<0.000000e+00> : vector<16x32xf32>
    %57 = tpu.matmul %54, %56, %cst_26 {dimension_numbers = #tpu.dot_dimension_numbers<[1], [0], [0], [1], [0, 0, 1, 1], [], []>} : vector<16x128xbf16>, vector<128x32xbf16>, vector<16x32xf32> -> vector<16x32xf32>
    %58 = arith.addf %50, %57 : vector<16x32xf32>
    %59 = vector.extract_strided_slice %1 {offsets = [0, 2], sizes = [16, 1], strides = [1, 1]} : vector<16x4xf32> to vector<16x1xf32>
    %60 = vector.broadcast %59 : vector<16x1xf32> to vector<16x128xf32>
    %61 = arith.mulf %60, %39 : vector<16x128xf32>
    %62 = arith.truncf %61 : vector<16x128xf32> to vector<16x128xbf16>
    %c2 = arith.constant 2 : index
    %c0_27 = arith.constant 0 : index
    %c0_28 = arith.constant 0 : index
    %63 = vector.load %arg9[%c2, %c0_27, %c0_28] : memref<4x128x32xbf16, #tpu.memory_space<vmem>>, vector<1x128x32xbf16>
    %64 = vector.shape_cast %63 : vector<1x128x32xbf16> to vector<128x32xbf16>
    %cst_29 = arith.constant dense<0.000000e+00> : vector<16x32xf32>
    %65 = tpu.matmul %62, %64, %cst_29 {dimension_numbers = #tpu.dot_dimension_numbers<[1], [0], [0], [1], [0, 0, 1, 1], [], []>} : vector<16x128xbf16>, vector<128x32xbf16>, vector<16x32xf32> -> vector<16x32xf32>
    %66 = arith.addf %58, %65 : vector<16x32xf32>
    %67 = vector.extract_strided_slice %1 {offsets = [0, 3], sizes = [16, 1], strides = [1, 1]} : vector<16x4xf32> to vector<16x1xf32>
    %68 = vector.broadcast %67 : vector<16x1xf32> to vector<16x128xf32>
    %69 = arith.mulf %68, %39 : vector<16x128xf32>
    %70 = arith.truncf %69 : vector<16x128xf32> to vector<16x128xbf16>
    %c3 = arith.constant 3 : index
    %c0_30 = arith.constant 0 : index
    %c0_31 = arith.constant 0 : index
    %71 = vector.load %arg9[%c3, %c0_30, %c0_31] : memref<4x128x32xbf16, #tpu.memory_space<vmem>>, vector<1x128x32xbf16>
    %72 = vector.shape_cast %71 : vector<1x128x32xbf16> to vector<128x32xbf16>
    %cst_32 = arith.constant dense<0.000000e+00> : vector<16x32xf32>
    %73 = tpu.matmul %70, %72, %cst_32 {dimension_numbers = #tpu.dot_dimension_numbers<[1], [0], [0], [1], [0, 0, 1, 1], [], []>} : vector<16x128xbf16>, vector<128x32xbf16>, vector<16x32xf32> -> vector<16x32xf32>
    %74 = arith.addf %66, %73 : vector<16x32xf32>
    %c0_33 = arith.constant 0 : index
    %c0_34 = arith.constant 0 : index
    %75 = vector.load %arg8[%c0_33, %c0_34] : memref<1x32xf32, #tpu.memory_space<vmem>>, vector<1x32xf32>
    %76 = vector.broadcast %75 : vector<1x32xf32> to vector<16x32xf32>
    %77 = arith.addf %74, %76 : vector<16x32xf32>
    %c0_35 = arith.constant 0 : index
    %c0_36 = arith.constant 0 : index
    %78 = vector.load %arg10[%c0_35, %c0_36] : memref<4x32xf32, #tpu.memory_space<vmem>>, vector<4x32xf32>
    %cst_37 = arith.constant dense<0.000000e+00> : vector<16x32xf32>
    %79 = tpu.matmul %1, %78, %cst_37 {dimension_numbers = #tpu.dot_dimension_numbers<[1], [0], [0], [1], [0, 0, 1, 1], [], []>} : vector<16x4xf32>, vector<4x32xf32>, vector<16x32xf32> -> vector<16x32xf32>
    %80 = arith.addf %77, %79 : vector<16x32xf32>
    %c0_38 = arith.constant 0 : index
    %c0_39 = arith.constant 0 : index
    %81 = vector.load %arg11[%c0_38, %c0_39] : memref<16x32xf32, #tpu.memory_space<vmem>>, vector<16x32xf32>
    tpu.vector_store %arg11[%c0_38, %c0_39], %80 {strides = array<i32>} : memref<16x32xf32, #tpu.memory_space<vmem>>, vector<16x32xf32>,
    return
  }
  func.func @transform_0(%arg0: i32) -> (i32, i32) {
    %c0_i32 = arith.constant 0 : i32
    %c0_i32_0 = arith.constant 0 : i32
    return %arg0, %c0_i32 : i32, i32
  }
  func.func @transform_1(%arg0: i32) -> (i32, i32) {
    %c0_i32 = arith.constant 0 : i32
    %c0_i32_0 = arith.constant 0 : i32
    return %arg0, %c0_i32 : i32, i32
  }
  func.func @transform_2(%arg0: i32) -> (i32, i32) {
    %c0_i32 = arith.constant 0 : i32
    %c0_i32_0 = arith.constant 0 : i32
    %c0_i32_1 = arith.constant 0 : i32
    return %c0_i32, %c0_i32_0 : i32, i32
  }
  func.func @transform_3(%arg0: i32) -> (i32, i32) {
    %c0_i32 = arith.constant 0 : i32
    %c0_i32_0 = arith.constant 0 : i32
    %c0_i32_1 = arith.constant 0 : i32
    return %c0_i32, %c0_i32_0 : i32, i32
  }
  func.func @transform_4(%arg0: i32) -> (i32, i32) {
    %c0_i32 = arith.constant 0 : i32
    %c0_i32_0 = arith.constant 0 : i32
    %c0_i32_1 = arith.constant 0 : i32
    return %c0_i32, %c0_i32_0 : i32, i32
  }
  func.func @transform_5(%arg0: i32) -> (i32, i32) {
    %c0_i32 = arith.constant 0 : i32
    %c0_i32_0 = arith.constant 0 : i32
    %c0_i32_1 = arith.constant 0 : i32
    return %c0_i32, %c0_i32_0 : i32, i32
  }
  func.func @transform_6(%arg0: i32) -> (i32, i32) {
    %c0_i32 = arith.constant 0 : i32
    %c0_i32_0 = arith.constant 0 : i32
    %c0_i32_1 = arith.constant 0 : i32
    return %c0_i32, %c0_i32_0 : i32, i32
  }
  func.func @transform_7(%arg0: i32) -> (i32, i32) {
    %c0_i32 = arith.constant 0 : i32
    %c0_i32_0 = arith.constant 0 : i32
    %c0_i32_1 = arith.constant 0 : i32
    return %c0_i32, %c0_i32_0 : i32, i32
  }
  func.func @transform_8(%arg0: i32) -> (i32, i32, i32) {
    %c0_i32 = arith.constant 0 : i32
    %c0_i32_0 = arith.constant 0 : i32
    %c0_i32_1 = arith.constant 0 : i32
    %c0_i32_2 = arith.constant 0 : i32
    return %c0_i32, %c0_i32_0, %c0_i32_1 : i32, i32, i32
  }
  func.func @transform_9(%arg0: i32) -> (i32, i32) {
    %c0_i32 = arith.constant 0 : i32
    %c0_i32_0 = arith.constant 0 : i32
    %c0_i32_1 = arith.constant 0 : i32
    return %c0_i32, %c0_i32_0 : i32, i32
  }
  func.func @transform_10(%arg0: i32) -> (i32, i32) {
    %c0_i32 = arith.constant 0 : i32
    %c0_i32_0 = arith.constant 0 : i32
    return %arg0, %c0_i32 : i32, i32
  }
}

</mosaic_0001>

<bundles_post_ra>
// kernel: tpu_custom_call.1
= control target key start
LH: loop header
LB: loop body
LE: loop exit
PB: predicated region body
PF: predicated region fallthrough
CT: control target
= control target key end

     0   :  { %15 = vsyncpa [#allocation3], 0  ;;  %s2147_s0 = inlined_call_operand.hbm [shape: bf16[16,32], index: 0, kind: input, shape index: {}]   ;;  %s2148_s1 = inlined_call_operand.hbm [shape: f32[16,4], index: 1, kind: input, shape index: {}]   ;;  %s2149_s2 = inlined_call_operand.hbm [shape: bf16[32,128], index: 2, kind: input, shape index: {}]   ;;  %s2150_s3 = inlined_call_operand.hbm [shape: f32[1,128], index: 3, kind: input, shape index: {}]   ;;  %s2151_s4 = inlined_call_operand.hbm [shape: bf16[128,128], index: 4, kind: input, shape index: {}]   ;;  %s2152_s5 = inlined_call_operand.hbm [shape: f32[4,128], index: 5, kind: input, shape index: {}]   ;;  %s2153_s6 = inlined_call_operand.hbm [shape: bf16[128,32], index: 6, kind: input, shape index: {}]   ;;  %s2154_s7 = inlined_call_operand.hbm [shape: f32[1,32], index: 7, kind: input, shape index: {}]   ;;  %s2155_s8 = inlined_call_operand.hbm [shape: bf16[4,128,32], index: 8, kind: input, shape index: {}]   ;;  %s2156_s9 = inlined_call_operand.hbm [shape: f32[4,32], index: 9, kind: input, shape index: {}]   ;;  %s2157_s10 = inlined_call_operand.hbm [shape: f32[16,32], index: 10, kind: output, shape index: {}]  }
   0x1   :  { %16 = vsyncpa [#allocation6], 0 }
   0x2   :  { %17 = vsyncpa [#allocation9], 0 }
   0x3   :  { %18 = vsyncpa [#allocation12], 0 }
   0x4   :  { %19 = vsyncpa [#allocation15], 0 }
   0x5   :  { %20 = vsyncpa [#allocation18], 0 }
   0x6   :  { %21 = vsyncpa [#allocation4], 0  ;;  %s1797_s13 = smov [#allocation5]   ;;  %s1541_s17 = scalar_lea.hbm %s2148_s1, 256 }
   0x7   :  { %s39_s14 = sshll.u32 %s1797_s13, 4  ;;  %p1542_p0 = scmp.ne.s32.totalorder %s2148_s1, %s1541_s17  ;;  %s40_s14 = int_to_ptr.vmem [resolvable:$true] %s39_s14 }
   0x8   :  { %p1545_p1 = scmp.lt.u32.totalorder %s1541_s17, %s2148_s1 }
   0xa   :  { %p1547_p2 = pnand %p1545_p1, %p1542_p0 }
   0xc   :  { %1550 = shalt.err (!%p1547_p2)
}
   0xd   :  { %s1551_s22 = scalar_lea.vmem %s40_s14, 256  ;;  %p1556_p4 = scmp.lt.s32.totalorder %s40_s14, %s40_s14 }
   0xe   :  { %p1552_p3 = scmp.ne.s32.totalorder %s40_s14, %s1551_s22  ;;  %p1557_p5 = scmp.lt.s32.totalorder %s1551_s22, %s1551_s22 }
  0x10   :  { %p1558_p6 = por %p1557_p5, %p1556_p4 }
  0x12   :  { %p1559_p7 = pnand %p1558_p6, %p1552_p3 }
  0x14   :  { %1562 = shalt.err (!%p1559_p7)
}
  0x15   :  { %s1798_s23 = smov 128   ;;  %s1799_s24 = smov 8  }
  0x16   :  { %45 = dma.hbm_to_vmem [thread:$0]  %s2148_s1, 256, %s40_s14, [#allocation6], %s1798_s23, %s1798_s23, %s1799_s24  }
  0x17   :  { %s1800_s27 = smov [#allocation8]   ;;  %s1801_s29 = smov [#allocation11]  }
  0x18   :  { %s64_s28 = sshll.u32 %s1800_s27, 4  ;;  %s86_s30 = sshll.u32 %s1801_s29, 4  ;;  %s65_s28 = int_to_ptr.vmem [resolvable:$true] %s64_s28  ;;  %s87_s30 = int_to_ptr.vmem [resolvable:$true] %s86_s30 }
  0x19   :  { %s1563_s13 = scalar_lea.hbm %s2150_s3, 16 }
  0x1a   :  { %p1564_p8 = scmp.ne.s32.totalorder %s2150_s3, %s1563_s13  ;;  %p1567_p9 = scmp.lt.u32.totalorder %s1563_s13, %s2150_s3 }
  0x1c   :  { %p1569_p10 = pnand %p1567_p9, %p1564_p8 }
  0x1e   :  { %1572 = shalt.err (!%p1569_p10)
}
  0x1f   :  { %s1573_s1 = scalar_lea.vmem %s65_s28, 16  ;;  %s1577_s14 = scalar_lea.vmem %s65_s28, 32 }
  0x20   :  { %p1574_p11 = scmp.ne.s32.totalorder %s65_s28, %s1573_s1  ;;  %p1578_p12 = scmp.lt.s32.totalorder %s65_s28, %s65_s28 }
  0x21   :  { %p1579_p13 = scmp.lt.s32.totalorder %s1577_s14, %s1573_s1 }
  0x23   :  { %p1580_p0 = por %p1579_p13, %p1578_p12 }
  0x25   :  { %p1581_p1 = pnand %p1580_p0, %p1574_p11 }
  0x27   :  { %1584 = shalt.err (!%p1581_p1)
}
  0x28   :  { %67 = dma.hbm_to_vmem [thread:$0]  %s2150_s3, 16, %s65_s28, [#allocation9]  }
  0x29   :  { %s1585_s25 = scalar_lea.hbm %s2152_s5, 64 }
  0x2a   :  { %p1586_p2 = scmp.ne.s32.totalorder %s2152_s5, %s1585_s25  ;;  %p1589_p3 = scmp.lt.u32.totalorder %s1585_s25, %s2152_s5 }
  0x2c   :  { %p1591_p4 = pnand %p1589_p3, %p1586_p2 }
  0x2e   :  { %1594 = shalt.err (!%p1591_p4)
}
  0x2f   :  { %s1595_s12 = scalar_lea.vmem %s87_s30, 64  ;;  %p1600_p6 = scmp.lt.s32.totalorder %s87_s30, %s87_s30 }
  0x30   :  { %p1596_p5 = scmp.ne.s32.totalorder %s87_s30, %s1595_s12  ;;  %p1601_p7 = scmp.lt.s32.totalorder %s1595_s12, %s1595_s12 }
  0x32   :  { %p1602_p8 = por %p1601_p7, %p1600_p6 }
  0x34   :  { %p1603_p9 = pnand %p1602_p8, %p1596_p5 }
  0x36   :  { %1606 = shalt.err (!%p1603_p9)
}
  0x37   :  { %89 = dma.hbm_to_vmem [thread:$0]  %s2152_s5, 64, %s87_s30, [#allocation12]  }
  0x38   :  { %s1802_s13 = smov [#allocation14]   ;;  %s1803_s16 = smov [#allocation2]  }
  0x39   :  { %s108_s15 = sshll.u32 %s1802_s13, 4  ;;  %s27_s17 = sshll.u32 %s1803_s16, 4  ;;  %s109_s15 = int_to_ptr.vmem [resolvable:$true] %s108_s15  ;;  %s28_s17 = int_to_ptr.vmem [resolvable:$true] %s27_s17 }
  0x3a   :  { %s1607_s14 = scalar_lea.hbm %s2154_s7, 16 }
  0x3b   :  { %p1608_p10 = scmp.ne.s32.totalorder %s2154_s7, %s1607_s14  ;;  %p1611_p11 = scmp.lt.u32.totalorder %s1607_s14, %s2154_s7 }
  0x3d   :  { %p1613_p12 = pnand %p1611_p11, %p1608_p10 }
  0x3f   :  { %1616 = shalt.err (!%p1613_p12)
}
  0x40   :  { %s1617_s5 = scalar_lea.vmem %s109_s15, 16  ;;  %s1621_s30 = scalar_lea.vmem %s109_s15, 32 }
  0x41   :  { %p1618_p13 = scmp.ne.s32.totalorder %s109_s15, %s1617_s5  ;;  %p1622_p0 = scmp.lt.s32.totalorder %s109_s15, %s109_s15 }
  0x42   :  { %p1623_p1 = scmp.lt.s32.totalorder %s1621_s30, %s1617_s5 }
  0x44   :  { %p1624_p2 = por %p1623_p1, %p1622_p0 }
  0x46   :  { %p1625_p3 = pnand %p1624_p2, %p1618_p13 }
  0x48   :  { %1628 = shalt.err (!%p1625_p3)
}
  0x49   :  { %111 = dma.hbm_to_vmem [thread:$0]  %s2154_s7, 16, %s109_s15, [#allocation15]  }
  0x4a   :  { %s1629_s11 = scalar_lea.hbm %s2147_s0, 128 }
  0x4b   :  { %p1630_p4 = scmp.ne.s32.totalorder %s2147_s0, %s1629_s11  ;;  %p1633_p5 = scmp.lt.u32.totalorder %s1629_s11, %s2147_s0 }
  0x4d   :  { %p1635_p6 = pnand %p1633_p5, %p1630_p4 }
  0x4f   :  { %1638 = shalt.err (!%p1635_p6)
}
  0x50   :  { %s1639_s16 = scalar_lea.vmem %s28_s17, 128  ;;  %p1644_p8 = scmp.lt.s32.totalorder %s28_s17, %s28_s17 }
  0x51   :  { %p1640_p7 = scmp.ne.s32.totalorder %s28_s17, %s1639_s16  ;;  %p1645_p9 = scmp.lt.s32.totalorder %s1639_s16, %s1639_s16 }
  0x53   :  { %p1646_p10 = por %p1645_p9, %p1644_p8 }
  0x55   :  { %p1647_p11 = pnand %p1646_p10, %p1640_p7 }
  0x57   :  { %1650 = shalt.err (!%p1647_p11)
}
  0x58   :  { %s1804_s7 = smov 64   ;;  %s1805_s15 = smov 4  }
  0x59   :  { %33 = dma.hbm_to_vmem [thread:$0]  %s2147_s0, 128, %s28_s17, [#allocation3], %s1804_s7, %s1804_s7, %s1805_s15  }
  0x5a   :  { %s1806_s14 = smov [#allocation7]   ;;  %s1807_s20 = smov [#allocation10]  }
  0x5b   :  { %s51_s19 = sshll.u32 %s1806_s14, 4  ;;  %s73_s21 = sshll.u32 %s1807_s20, 4  ;;  %s52_s19 = int_to_ptr.vmem [resolvable:$true] %s51_s19  ;;  %s74_s21 = int_to_ptr.vmem [resolvable:$true] %s73_s21 }
  0x5c   :  { %s1651_s30 = scalar_lea.hbm %s2149_s2, 256 }
  0x5d   :  { %p1652_p12 = scmp.ne.s32.totalorder %s2149_s2, %s1651_s30  ;;  %p1655_p13 = scmp.lt.u32.totalorder %s1651_s30, %s2149_s2 }
  0x5f   :  { %p1657_p0 = pnand %p1655_p13, %p1652_p12 }
  0x61   :  { %1660 = shalt.err (!%p1657_p0)
}
  0x62   :  { %s1661_s0 = scalar_lea.vmem %s52_s19, 256  ;;  %p1666_p2 = scmp.lt.s32.totalorder %s52_s19, %s52_s19 }
  0x63   :  { %p1662_p1 = scmp.ne.s32.totalorder %s52_s19, %s1661_s0  ;;  %p1667_p3 = scmp.lt.s32.totalorder %s1661_s0, %s1661_s0 }
  0x65   :  { %p1668_p4 = por %p1667_p3, %p1666_p2 }
  0x67   :  { %p1669_p5 = pnand %p1668_p4, %p1662_p1 }
  0x69   :  { %1672 = shalt.err (!%p1669_p5)
}
  0x6a   :  { %57 = dma.hbm_to_vmem [thread:$0]  %s2149_s2, 256, %s52_s19, [#allocation6], %s1804_s7, %s1804_s7, %s1805_s15  }
  0x6b   :  { %s1673_s28 = scalar_lea.hbm %s2151_s4, 1024 }
  0x6c   :  { %p1674_p6 = scmp.ne.s32.totalorder %s2151_s4, %s1673_s28  ;;  %p1677_p7 = scmp.lt.u32.totalorder %s1673_s28, %s2151_s4 }
  0x6e   :  { %p1679_p8 = pnand %p1677_p7, %p1674_p6 }
  0x70   :  { %1682 = shalt.err (!%p1679_p8)
}
  0x71   :  { %s1683_s14 = scalar_lea.vmem %s74_s21, 1024  ;;  %p1688_p10 = scmp.lt.s32.totalorder %s74_s21, %s74_s21 }
  0x72   :  { %p1684_p9 = scmp.ne.s32.totalorder %s74_s21, %s1683_s14  ;;  %p1689_p11 = scmp.lt.s32.totalorder %s1683_s14, %s1683_s14 }
  0x74   :  { %p1690_p12 = por %p1689_p11, %p1688_p10 }
  0x76   :  { %p1691_p13 = pnand %p1690_p12, %p1684_p9 }
  0x78   :  { %1694 = shalt.err (!%p1691_p13)
}
  0x79   :  { %79 = dma.hbm_to_vmem [thread:$0]  %s2151_s4, 1024, %s74_s21, [#allocation9], %s1804_s7, %s1804_s7, %s1805_s15  }
  0x7a   :  { %s1808_s20 = smov [#allocation13]   ;;  %s1809_s5 = smov [#allocation16]  }
  0x7b   :  { %s95_s22 = sshll.u32 %s1808_s20, 4  ;;  %s117_s30 = sshll.u32 %s1809_s5, 4  ;;  %s96_s22 = int_to_ptr.vmem [resolvable:$true] %s95_s22  ;;  %s118_s30 = int_to_ptr.vmem [resolvable:$true] %s117_s30 }
  0x7c   :  { %s1695_s27 = scalar_lea.hbm %s2153_s6, 1024 }
  0x7d   :  { %p1696_p0 = scmp.ne.s32.totalorder %s2153_s6, %s1695_s27  ;;  %p1699_p1 = scmp.lt.u32.totalorder %s1695_s27, %s2153_s6 }
  0x7f   :  { %p1701_p2 = pnand %p1699_p1, %p1696_p0 }
  0x81   :  { %1704 = shalt.err (!%p1701_p2)
}
  0x82   :  { %s1705_s4 = scalar_lea.vmem %s96_s22, 1024  ;;  %p1710_p4 = scmp.lt.s32.totalorder %s96_s22, %s96_s22 }
  0x83   :  { %p1706_p3 = scmp.ne.s32.totalorder %s96_s22, %s1705_s4  ;;  %p1711_p5 = scmp.lt.s32.totalorder %s1705_s4, %s1705_s4 }
  0x85   :  { %p1712_p6 = por %p1711_p5, %p1710_p4 }
  0x87   :  { %p1713_p7 = pnand %p1712_p6, %p1706_p3 }
  0x89   :  { %1716 = shalt.err (!%p1713_p7)
}
  0x8a   :  { %101 = dma.hbm_to_vmem [thread:$0]  %s2153_s6, 1024, %s96_s22, [#allocation12], %s1804_s7, %s1804_s7, %s1805_s15  }
  0x8b   :  { %s1717_s13 = scalar_lea.hbm %s2155_s8, 4096 }
  0x8c   :  { %p1718_p8 = scmp.ne.s32.totalorder %s2155_s8, %s1717_s13  ;;  %p1721_p9 = scmp.lt.u32.totalorder %s1717_s13, %s2155_s8 }
  0x8e   :  { %p1723_p10 = pnand %p1721_p9, %p1718_p8 }
  0x90   :  { %1726 = shalt.err (!%p1723_p10)
}
  0x91   :  { %s1727_s2 = scalar_lea.vmem %s118_s30, 4096  ;;  %p1732_p12 = scmp.lt.s32.totalorder %s118_s30, %s118_s30 }
  0x92   :  { %p1728_p11 = scmp.ne.s32.totalorder %s118_s30, %s1727_s2  ;;  %p1733_p13 = scmp.lt.s32.totalorder %s1727_s2, %s1727_s2 }
  0x94   :  { %p1734_p0 = por %p1733_p13, %p1732_p12 }
  0x96   :  { %p1735_p1 = pnand %p1734_p0, %p1728_p11 }
  0x98   :  { %1738 = shalt.err (!%p1735_p1)
}
  0x99   :  { %123 = dma.hbm_to_vmem [thread:$0]  %s2155_s8, 4096, %s118_s30, [#allocation15], %s1804_s7, %s1804_s7, %s1805_s15  }
  0x9a   :  { %s1810_s20 = smov [#allocation17]   ;;  %s1739_s26 = scalar_lea.hbm %s2156_s9, 64 }
  0x9b   :  { %s130_s22 = sshll.u32 %s1810_s20, 4  ;;  %p1740_p2 = scmp.ne.s32.totalorder %s2156_s9, %s1739_s26  ;;  %s131_s22 = int_to_ptr.vmem [resolvable:$true] %s130_s22 }
  0x9c   :  { %p1743_p3 = scmp.lt.u32.totalorder %s1739_s26, %s2156_s9 }
  0x9e   :  { %p1745_p4 = pnand %p1743_p3, %p1740_p2 }
  0xa0   :  { %1748 = shalt.err (!%p1745_p4)
}
  0xa1   :  { %s1749_s11 = scalar_lea.vmem %s131_s22, 64  ;;  %p1754_p6 = scmp.lt.s32.totalorder %s131_s22, %s131_s22 }
  0xa2   :  { %p1750_p5 = scmp.ne.s32.totalorder %s131_s22, %s1749_s11  ;;  %p1755_p7 = scmp.lt.s32.totalorder %s1749_s11, %s1749_s11 }
  0xa4   :  { %p1756_p8 = por %p1755_p7, %p1754_p6 }
  0xa6   :  { %p1757_p9 = pnand %p1756_p8, %p1750_p5 }
  0xa8   :  { %1760 = shalt.err (!%p1757_p9)
}
  0xa9   :  { %133 = dma.hbm_to_vmem [thread:$0]  %s2156_s9, 64, %s131_s22, [#allocation18]  }
  0xaa   :  { %1783 = dma.done.wait [#allocation3], 128  }
  0xab   :  { %1784 = vsyncadd [#allocation3], 4294967168 }
  0xac   :  { %1785 = dma.done.wait [#allocation6], 512  }
  0xad   :  { %1786 = vsyncadd [#allocation6], 4294966784 }
  0xae   :  { %1787 = dma.done.wait [#allocation9], 1040  }
  0xaf   :  { %1788 = vsyncadd [#allocation9], 4294966256 }
  0xb0   :  { %1789 = dma.done.wait [#allocation12], 1088  }
  0xb1   :  { %1790 = vsyncadd [#allocation12], 4294966208 }
  0xb2   :  { %1791 = dma.done.wait [#allocation15], 4112  }
  0xb3   :  { %1792 = vsyncadd [#allocation15], 4294963184 }
  0xb4   :  { %1793 = dma.done.wait [#allocation18], 64  }
  0xb5   :  { %1794 = vsyncadd [#allocation18], 4294967232  ;;  %v1811_v0 = vmov 1   ;;  %v1812_v1 = vmov 3   ;;  %v2015_v2 = vld [vmem:[#allocation5] sm:$0xff]  ;;  %v2017_v3 = vld [vmem:[#allocation5 + $0x8] sm:$0xff] }
  0xb6   :  { %1475 = vset.pattern.permute.xlu0 %v1811_v0  ;;  %1477 = vset.pattern.permute.xlu1 %v1812_v1  ;;  %v169_v4 = vpack.c.bf16 %v2017_v3, %v2015_v2  ;;  %v1813_v5 = vmov 2   ;;  %v1814_v6 = vmov 0   ;;  %v1487_v7 = vld [vmem:[#allocation10] sm:$0xff]   ;;  %v1815_v8 = vmov 0.0   ;;  %v1488_v9 = vld [vmem:[#allocation10 + $0x8] sm:$0xff]   ;;  %v1489_v10 = vld [vmem:[#allocation10 + $0x10] sm:$0xff]  }
  0xb7   :  { %1314 = vmatprep.subr.bf16.mxu0 %v1815_v8  ;;  %v1490_v11 = vld [vmem:[#allocation10 + $0x18] sm:$0xff]   ;;  %v1491_v12 = vld [vmem:[#allocation10 + $0x20] sm:$0xff]   ;;  %v1492_v13 = vld [vmem:[#allocation10 + $0x28] sm:$0xff]   ;;  %vm1816_vm0 = vmmov 0   ;;  %s1817_s9 = smov 32   ;;  %vm399_vm1 = vcmask 1043456  }
  0xb8   :  { %187 = vperm.xlu0 %1475, %v169_v4   ;;  %197 = vperm.xlu1 %1477, %v169_v4   ;;  %v1493_v14 = vld [vmem:[#allocation10 + $0x30] sm:$0xff]   ;;  %v1494_v15 = vld [vmem:[#allocation10 + $0x38] sm:$0xff]   ;;  %v391_v22 = vld [vmem:[#allocation11] sm:$0xf]  ;;  %vm392_vm2 = vcmask 31744   ;;  %s1818_s30 = smov 96  }
  0xb9   :  { %1315 = vmatpush3.bf16.msra.mxu0 %v1487_v7  ;;  %1330 = vmatprep.mubr.msk.bf16.mxu0 %vm1816_vm0, %v1815_v8  ;;  %v1486_v16 = vld [vmem:[#allocation2] sm:$0xff]   ;;  %vm210_vm3 = vcmask 261120   ;;  %vm214_vm4 = vcmask 523264   ;;  %vm217_vm5 = vcmask 785408   ;;  %v1495_v30 = vld [vmem:[#allocation7] sm:$0xff]   ;;  %v1497_v34 = vld [vmem:[#allocation13] sm:$0xff]  }
  0xba   :  { %1316 = vmatprep.subr.bf16.mxu0 %v1815_v8  ;;  %1342 = vmatprep.subr.msk.mxu1 %vm399_vm1, %v391_v22  ;;  %v1496_v33 = vld [vmem:[#allocation7 + $0x8] sm:$0xff]   ;;  %v1498_v37 = vld [vmem:[#allocation16] sm:$0xff]   ;;  %v1500_v39 = vld [vmem:[#allocation16 + $0x8] sm:$0xff]  }
  0xbb   :  { %1344 = vmatprep.mubr.msk.f32.mxu1 %vm392_vm2, %v2015_v2  ;;  %1343 = vmatpush3.msk.msra.mxu1 %vm399_vm1, %v391_v22  ;;  %v1499_v38 = vld [vmem:[#allocation13 + $0x8] sm:$0xff]   ;;  %v1501_v40 = vld [vmem:[#allocation13 + $0x10] sm:$0xff]   ;;  %v1503_v42 = vld [vmem:[#allocation13 + $0x18] sm:$0xff]  }
  0xbc   :  { %1476 = vset.pattern.permute.xlu0 %v1813_v5  ;;  %1478 = vset.pattern.permute.xlu1 %v1814_v6  ;;  %v1502_v41 = vld [vmem:[#allocation16 + $0x10] sm:$0xff]   ;;  %v1504_v43 = vld [vmem:[#allocation16 + $0x18] sm:$0xff]   ;;  %v1506_v45 = vld [vmem:[#allocation16 + $0x20] sm:$0xff]  }
  0xbd   :  { %192 = vperm.xlu0 %1476, %v169_v4   ;;  %176 = vperm.xlu1 %1478, %v169_v4   ;;  %v1505_v44 = vld [vmem:[#allocation13 + $0x20] sm:$0xff]   ;;  %v1507_v46 = vld [vmem:[#allocation13 + $0x28] sm:$0xff]   ;;  %v1509_v48 = vld [vmem:[#allocation13 + $0x30] sm:$0xff]  }
  0xbe   :  { %1317 = vmatpush3.bf16.msra.mxu0 %v1488_v9  ;;  %1345 = vmatmul.mubr.msk.f32.vlgmr.msra.gmra.mrb[0].mxu1 %vm392_vm2, %v2017_v3  ;;  %v1508_v47 = vld [vmem:[#allocation16 + $0x28] sm:$0xff]   ;;  %v1510_v49 = vld [vmem:[#allocation16 + $0x30] sm:$0xff]   ;;  %v1512_v51 = vld [vmem:[#allocation16 + $0x38] sm:$0xff]  }
  0xbf   :  { %1318 = vmatprep.subr.bf16.mxu0 %v1815_v8  ;;  %1347 = vmatprep.subr.bf16.mxu1 %v1815_v8  ;;  %v1511_v50 = vld [vmem:[#allocation13 + $0x38] sm:$0xff]  }
  0xc0   :  { %1363 = vmatprep.mubr.msk.bf16.mxu1 %vm1816_vm0, %v1815_v8  ;;  %1348 = vmatpush3.bf16.msra.mxu1 %v1498_v37  ;;  %v1203_v57 = vld [vmem:[#allocation8] ss:$0 sm:$0xff] }
  0xc1   :  { %1479 = vset.pattern.permute.xlu0 %v1814_v6  ;;  %1349 = vmatprep.subr.bf16.mxu1 %v1815_v8 }
  0xc2   :  { %1319 = vmatpush3.bf16.msra.mxu0 %v1489_v10 }
  0xc3   :  { %1320 = vmatprep.subr.bf16.mxu0 %v1815_v8 }
  0xc4   :  { %1350 = vmatpush3.bf16.msra.mxu1 %v1500_v39 }
  0xc5   :  { %1351 = vmatprep.subr.bf16.mxu1 %v1815_v8 }
  0xc6   :  { %1321 = vmatpush3.bf16.msra.mxu0 %v1490_v11 }
  0xc7   :  { %1322 = vmatprep.subr.bf16.mxu0 %v1815_v8 }
  0xc8   :  { %1352 = vmatpush3.bf16.msra.mxu1 %v1502_v41 }
  0xc9   :  { %1353 = vmatprep.subr.bf16.mxu1 %v1815_v8 }
  0xca   :  { %1323 = vmatpush3.bf16.msra.mxu0 %v1491_v12 }
  0xcb   :  { %1324 = vmatprep.subr.bf16.mxu0 %v1815_v8 }
  0xcc   :  { %1354 = vmatpush3.bf16.msra.mxu1 %v1504_v43 }
  0xcd   :  { %1355 = vmatprep.subr.bf16.mxu1 %v1815_v8 }
  0xce   :  { %1325 = vmatpush3.bf16.msra.mxu0 %v1492_v13 }
  0xcf   :  { %1326 = vmatprep.subr.bf16.mxu0 %v1815_v8 }
  0xd0   :  { %1356 = vmatpush3.bf16.msra.mxu1 %v1506_v45 }
  0xd1   :  { %1357 = vmatprep.subr.bf16.mxu1 %v1815_v8 }
  0xd2   :  { %1327 = vmatpush3.bf16.msra.mxu0 %v1493_v14 }
  0xd3   :  { %1328 = vmatprep.subr.bf16.mxu0 %v1815_v8 }
  0xd4   :  { %1358 = vmatpush3.bf16.msra.mxu1 %v1508_v47  ;;  %v1515_v47 = vld [vmem:[#allocation16 + $0x88] sm:$0xff]  }
  0xd5   :  { %1359 = vmatprep.subr.bf16.mxu1 %v1815_v8 }
  0xd6   :  { %1329 = vmatpush3.bf16.msra.mxu0 %v1494_v15 }
  0xd7   :  { %1334 = vmatprep.subr.bf16.mxu0 %v1815_v8 }
  0xd8   :  { %1360 = vmatpush3.bf16.msra.mxu1 %v1510_v49  ;;  %v1517_v49 = vld [vmem:[#allocation16 + $0x90] sm:$0xff]  }
  0xd9   :  { %1361 = vmatprep.subr.bf16.mxu1 %v1815_v8 }
  0xdc   :  { %1362 = vmatpush3.bf16.msra.mxu1 %v1512_v51  ;;  %v1519_v51 = vld [vmem:[#allocation16 + $0x98] sm:$0xff]  }
  0xdd   :  { %1387 = vmatprep.subr.bf16.mxu1 %v1815_v8 }
 0x137   :  { %v188_v17 = vpop.permute.xlu0 %187  ;;  %v198_v18 = vpop.permute.xlu1 %197 }
 0x138   :  { %v190_v19 = vmul.bf16 %v1486_v16, %v188_v17  ;;  %v200_v20 = vmul.bf16 %v1486_v16, %v198_v18 }
 0x13a   :  { %202 = vrot.lane.b32.xlu1 %v190_v19, %s1817_s9 }
 0x13c   :  { %v193_v21 = vpop.permute.xlu0 %192  ;;  %v177_v24 = vpop.permute.xlu1 %176 }
 0x13d   :  { %v195_v23 = vmul.bf16 %v1486_v16, %v193_v21  ;;  %v185_v26 = vmul.bf16 %v1486_v16, %v177_v24 }
 0x13e   :  { %208 = vrot.lane.b32.xlu1 %v200_v20, %s1818_s30 }
 0x13f   :  { %205 = vrot.lane.b32.xlu0 %v195_v23, %s1804_s7  ;;  %s1819_s7 = smov [#allocation19]  }
 0x140   :  { %s1174_s4 = sshll.u32 %s1819_s7, 4  ;;  %s1175_s4 = int_to_ptr.vmem [resolvable:$true] %s1174_s4 }
 0x141   :  { %s1761_s21 = scalar_lea.vmem %s1175_s4, 256  ;;  %p1766_p11 = scmp.lt.s32.totalorder %s1175_s4, %s1175_s4 }
 0x142   :  { %520 = vperm.xlu1 %1478, %v2017_v3   ;;  %p1762_p10 = scmp.ne.s32.totalorder %s1175_s4, %s1761_s21  ;;  %p1767_p12 = scmp.lt.s32.totalorder %s1761_s21, %s1761_s21 }
 0x143   :  { %516 = vperm.xlu0 %1479, %v2015_v2  }
 0x144   :  { %p1768_p13 = por %p1767_p12, %p1766_p11 }
 0x146   :  { %1480 = vset.pattern.permute.xlu1 %v1811_v0  ;;  %p1769_p0 = pnand %p1768_p13, %p1762_p10 }
 0x147   :  { %721 = vperm.xlu1 %1480, %v2015_v2   ;;  %1481 = vset.pattern.permute.xlu0 %v1811_v0 }
 0x148   :  { %725 = vperm.xlu0 %1481, %v2017_v3  }
 0x14b   :  { %1482 = vset.pattern.permute.xlu1 %v1812_v1 }
 0x14c   :  { %959 = vperm.xlu1 %1482, %v2015_v2   ;;  %1483 = vset.pattern.permute.xlu0 %v1813_v5 }
 0x14d   :  { %840 = vperm.xlu0 %1483, %v2015_v2  }
 0x150   :  { %963 = vperm.xlu1 %1482, %v2017_v3  }
 0x151   :  { %1485 = vset.pattern.permute.xlu0 %v1812_v1 }
 0x154   :  { %1484 = vset.pattern.permute.xlu1 %v1813_v5 }
 0x155   :  { %844 = vperm.xlu1 %1484, %v2017_v3  }
 0x191   :  { %v2065_v35 = vpop.f32.mrb[0].mxu1 }
 0x192   :  { %v469_v36 = vpop.f32.mrb[1].mxu1 }
 0x1ac   :  { %v203_v25 = vpop.permute.xlu1 %202 }
 0x1ad   :  { %v213_v28 = vsel %vm210_vm3, %v185_v26, %v203_v25 }
 0x1b0   :  { %v209_v27 = vpop.permute.xlu1 %208 }
 0x1b1   :  { %v206_v29 = vpop.permute.xlu0 %205 }
 0x1b2   :  { %v216_v31 = vsel %vm214_vm4, %v213_v28, %v206_v29 }
 0x1b3   :  { %v219_v32 = vsel %vm217_vm5, %v216_v31, %v209_v27 }
 0x1b4   :  { %1331 = vmatmul.mubr.bf16.vlgmr.msra.gmra.mrb[0].mxu0 %v219_v32 }
 0x1b5   :  { %1335 = vmatpush3.bf16.msra.mxu0 %v1495_v30  ;;  %1338 = vmatprep.mubr.msk.bf16.mxu0 %vm1816_vm0, %v1815_v8 }
 0x1b6   :  { %1336 = vmatprep.subr.bf16.mxu0 %v1815_v8 }
 0x1b9   :  { %1337 = vmatpush3.bf16.msra.mxu0 %v1496_v33 }
 0x1ba   :  { %1367 = vmatprep.subr.bf16.mxu0 %v1815_v8 }
 0x1bc   :  { %1339 = vmatmul.mubr.msk.bf16.vlgmr.msra.gmra.mrb[4].mxu0 %vm210_vm3, %v1486_v16 }
 0x1bd   :  { %1383 = vmatprep.mubr.msk.bf16.mxu0 %vm1816_vm0, %v1815_v8  ;;  %1368 = vmatpush3.bf16.msra.mxu0 %v1497_v34 }
 0x1be   :  { %1369 = vmatprep.subr.bf16.mxu0 %v1815_v8 }
 0x1c1   :  { %1370 = vmatpush3.bf16.msra.mxu0 %v1499_v38  ;;  %v521_v6 = vpop.permute.xlu1 %520 }
 0x1c2   :  { %1371 = vmatprep.subr.bf16.mxu0 %v1815_v8  ;;  %v517_v18 = vpop.permute.xlu0 %516 }
 0x1c5   :  { %1372 = vmatpush3.bf16.msra.mxu0 %v1501_v40  ;;  %v1513_v40 = vld [vmem:[#allocation16 + $0x80] sm:$0xff]  }
 0x1c6   :  { %1373 = vmatprep.subr.bf16.mxu0 %v1815_v8  ;;  %v722_v14 = vpop.permute.xlu1 %721 }
 0x1c7   :  { %v726_v20 = vpop.permute.xlu0 %725 }
 0x1c9   :  { %1374 = vmatpush3.bf16.msra.mxu0 %v1503_v42  ;;  %v1514_v42 = vld [vmem:[#allocation16 + $0x40] sm:$0xff]  }
 0x1ca   :  { %1375 = vmatprep.subr.bf16.mxu0 %v1815_v8 }
 0x1cb   :  { %v960_v19 = vpop.permute.xlu1 %959 }
 0x1cc   :  { %v841_v29 = vpop.permute.xlu0 %840 }
 0x1cd   :  { %1376 = vmatpush3.bf16.msra.mxu0 %v1505_v44 }
 0x1ce   :  { %1377 = vmatprep.subr.bf16.mxu0 %v1815_v8 }
 0x1cf   :  { %v964_v21 = vpop.permute.xlu1 %963 }
 0x1d1   :  { %1378 = vmatpush3.bf16.msra.mxu0 %v1507_v46 }
 0x1d2   :  { %1379 = vmatprep.subr.bf16.mxu0 %v1815_v8 }
 0x1d4   :  { %v845_v30 = vpop.permute.xlu1 %844 }
 0x1d5   :  { %1380 = vmatpush3.bf16.msra.mxu0 %v1509_v48  ;;  %v1516_v48 = vld [vmem:[#allocation16 + $0x48] sm:$0xff]  }
 0x1d6   :  { %1381 = vmatprep.subr.bf16.mxu0 %v1815_v8 }
 0x1d9   :  { %1382 = vmatpush3.bf16.msra.mxu0 %v1511_v50  ;;  %v1518_v50 = vld [vmem:[#allocation16 + $0x50] sm:$0xff]  }
 0x1da   :  { %1407 = vmatprep.subr.bf16.mxu0 %v1815_v8 }
 0x287   :  { %v319_v52 = vpop.f32.mrb[0].mxu0 }
 0x288   :  { %v1332_v53 = vpop.f32.mrb[1].mxu0 }
 0x289   :  { %v322_v54 = vpop.f32.mrb[2].mxu0  ;;  %v1521_v53 = vld [vmem:[#allocation16 + $0xa0] sm:$0xff]  }
 0x28a   :  { %v1333_v55 = vpop.f32.mrb[3].mxu0 }
 0x28b   :  { %v1523_v55 = vld [vmem:[#allocation16 + $0xa8] sm:$0xff]  }
 0x28f   :  { %v375_v56 = vpop.f32.mrb[4].mxu0 }
 0x290   :  { %v376_v58 = vadd.f32 %v375_v56, %v319_v52  ;;  %v1340_v59 = vpop.f32.mrb[5].mxu0  ;;  %v1520_v52 = vld [vmem:[#allocation16 + $0x58] sm:$0xff]   ;;  %v1524_v56 = vld [vmem:[#allocation16 + $0x68] sm:$0xff]  }
 0x291   :  { %v378_v60 = vpop.f32.mrb[6].mxu0  ;;  %v1527_v59 = vld [vmem:[#allocation16 + $0xb8] sm:$0xff]  }
 0x292   :  { %v379_v61 = vadd.f32 %v378_v60, %v322_v54  ;;  %v1341_v62 = vpop.f32.mrb[7].mxu0  ;;  %v389_v63 = vadd.f32 %v1203_v57, %v376_v58  ;;  %v1522_v54 = vld [vmem:[#allocation16 + $0x60] sm:$0xff]   ;;  %v1526_v58 = vld [vmem:[#allocation16 + $0x70] sm:$0xff]   ;;  %v1528_v60 = vld [vmem:[#allocation16 + $0x78] sm:$0xff]  }
 0x293   :  { %v1530_v62 = vld [vmem:[#allocation16 + $0xc8] sm:$0xff]  }
 0x294   :  { %v390_v0 = vadd.f32 %v1203_v57, %v379_v61  ;;  %v478_v1 = vadd.f32 %v469_v36, %v389_v63  ;;  %v1525_v57 = vld [vmem:[#allocation16 + $0xb0] sm:$0xff]   ;;  %v1529_v61 = vld [vmem:[#allocation16 + $0xc0] sm:$0xff]  }
 0x295   :  { %v1531_v63 = vld [vmem:[#allocation16 + $0xd0] sm:$0xff]  }
 0x296   :  { %v479_v4 = vadd.f32 %v2065_v35, %v390_v0  ;;  %v482_v5 = vmul.f32 0.044715, %v478_v1  ;;  %v480_v23 = vmul.f32 0.5, %v478_v1  ;;  %v1532_v0 = vld [vmem:[#allocation16 + $0xd8] sm:$0xff]  }
 0x298   :  { %v483_v7 = vmul.f32 0.044715, %v479_v4  ;;  %v484_v9 = vmul.f32 %v482_v5, %v478_v1  ;;  %v481_v26 = vmul.f32 0.5, %v479_v4  ;;  %v1535_v5 = vld [vmem:[#allocation16 + $0xf0] sm:$0xff]  }
 0x29a   :  { %v485_v10 = vmul.f32 %v483_v7, %v479_v4  ;;  %v486_v11 = vmul.f32 %v484_v9, %v478_v1  ;;  %v1086_v7 = vld [vmem:[#allocation17] sm:$0xf] }
 0x29c   :  { %v487_v12 = vmul.f32 %v485_v10, %v479_v4  ;;  %v488_v13 = vadd.f32 %v486_v11, %v478_v1  ;;  %v1533_v1 = vld [vmem:[#allocation16 + $0xe0] sm:$0xff]  }
 0x29e   :  { %v489_v15 = vadd.f32 %v487_v12, %v479_v4  ;;  %v490_v16 = vmul.f32 0.7978846, %v488_v13  ;;  %v1534_v4 = vld [vmem:[#allocation16 + $0xe8] sm:$0xff]  }
 0x2a0   :  { %v491_v17 = vmul.f32 0.7978846, %v489_v15  ;;  %1537 = vtanh.f32 %v490_v16 }
 0x2a2   :  { %1539 = vtanh.f32 %v491_v17 }
 0x2aa   :  { %v1538_v22 = vpop.eup %1537 }
 0x2ab   :  { %v494_v24 = vadd.f32 1.0, %v1538_v22 }
 0x2ac   :  { %v1540_v25 = vpop.eup %1539 }
 0x2ad   :  { %v495_v27 = vadd.f32 1.0, %v1540_v25  ;;  %v496_v28 = vmul.f32 %v494_v24, %v480_v23 }
 0x2af   :  { %v497_v31 = vmul.f32 %v495_v27, %v481_v26  ;;  %v2084_v32 = vmul.f32 %v722_v14, %v496_v28  ;;  %v523_v33 = vmul.f32 %v517_v18, %v496_v28  ;;  %v2086_v34 = vmul.f32 %v960_v19, %v496_v28 }
 0x2b0   :  { %v847_v35 = vmul.f32 %v841_v29, %v496_v28 }
 0x2b1   :  { %v524_v36 = vmul.f32 %v521_v6, %v497_v31  ;;  %v729_v37 = vmul.f32 %v726_v20, %v497_v31  ;;  %v2088_v38 = vmul.f32 %v964_v21, %v497_v31  ;;  %v848_v39 = vmul.f32 %v845_v30, %v497_v31  ;;  %v1536_v6 = vld [vmem:[#allocation16 + $0xf8] sm:$0xff]  }
 0x2b2   :  { %v498_v41 = vpack.c.bf16 %v497_v31, %v496_v28 }
 0x2b3   :  { %v525_v43 = vpack.c.bf16 %v524_v36, %v523_v33  ;;  %v730_v44 = vpack.c.bf16 %v729_v37, %v2084_v32  ;;  %v968_v45 = vpack.c.bf16 %v2088_v38, %v2086_v34  ;;  %v849_v46 = vpack.c.bf16 %v848_v39, %v847_v35  ;;  %v1247_v34 = vld [vmem:[#allocation14] ss:$0 sm:$0xff] }
 0x2b4   :  { %1384 = vmatmul.mubr.bf16.vlgmr.msra.gmra.mrb[8].mxu0 %v498_v41 }
 0x2b5   :  { %1408 = vmatpush3.bf16.msra.mxu0 %v1513_v40  ;;  %1364 = vmatmul.mubr.bf16.vlgmr.msra.gmra.mrb[4].mxu1 %v525_v43 }
 0x2b6   :  { %1388 = vmatpush3.bf16.msra.mxu1 %v1514_v42  ;;  %1409 = vmatprep.subr.bf16.mxu0 %v1815_v8 }
 0x2b7   :  { %1389 = vmatprep.subr.bf16.mxu1 %v1815_v8  ;;  %1423 = vmatprep.mubr.msk.bf16.mxu0 %vm1816_vm0, %v1815_v8 }
 0x2b8   :  { %1403 = vmatprep.mubr.msk.bf16.mxu1 %vm1816_vm0, %v1815_v8 }
 0x2b9   :  { %1410 = vmatpush3.bf16.msra.mxu0 %v1515_v47 }
 0x2ba   :  { %1390 = vmatpush3.bf16.msra.mxu1 %v1516_v48  ;;  %1411 = vmatprep.subr.bf16.mxu0 %v1815_v8 }
 0x2bb   :  { %1391 = vmatprep.subr.bf16.mxu1 %v1815_v8 }
 0x2bd   :  { %1412 = vmatpush3.bf16.msra.mxu0 %v1517_v49 }
 0x2be   :  { %1392 = vmatpush3.bf16.msra.mxu1 %v1518_v50  ;;  %1413 = vmatprep.subr.bf16.mxu0 %v1815_v8 }
 0x2bf   :  { %1393 = vmatprep.subr.bf16.mxu1 %v1815_v8 }
 0x2c1   :  { %1414 = vmatpush3.bf16.msra.mxu0 %v1519_v51 }
 0x2c2   :  { %1394 = vmatpush3.bf16.msra.mxu1 %v1520_v52  ;;  %1415 = vmatprep.subr.bf16.mxu0 %v1815_v8 }
 0x2c3   :  { %1395 = vmatprep.subr.bf16.mxu1 %v1815_v8 }
 0x2c5   :  { %1416 = vmatpush3.bf16.msra.mxu0 %v1521_v53 }
 0x2c6   :  { %1396 = vmatpush3.bf16.msra.mxu1 %v1522_v54  ;;  %1417 = vmatprep.subr.bf16.mxu0 %v1815_v8 }
 0x2c7   :  { %1397 = vmatprep.subr.bf16.mxu1 %v1815_v8 }
 0x2c9   :  { %1418 = vmatpush3.bf16.msra.mxu0 %v1523_v55 }
 0x2ca   :  { %1398 = vmatpush3.bf16.msra.mxu1 %v1524_v56  ;;  %1419 = vmatprep.subr.bf16.mxu0 %v1815_v8 }
 0x2cb   :  { %1399 = vmatprep.subr.bf16.mxu1 %v1815_v8 }
 0x2cd   :  { %1420 = vmatpush3.bf16.msra.mxu0 %v1525_v57 }
 0x2ce   :  { %1400 = vmatpush3.bf16.msra.mxu1 %v1526_v58  ;;  %1421 = vmatprep.subr.bf16.mxu0 %v1815_v8 }
 0x2cf   :  { %1401 = vmatprep.subr.bf16.mxu1 %v1815_v8 }
 0x2d1   :  { %1422 = vmatpush3.bf16.msra.mxu0 %v1527_v59 }
 0x2d2   :  { %1402 = vmatpush3.bf16.msra.mxu1 %v1528_v60 }
 0x2d3   :  { %1427 = vmatprep.subr.bf16.mxu1 %v1815_v8 }
 0x2d4   :  { %1424 = vmatmul.mubr.bf16.vlgmr.msra.gmra.mrb[12].mxu0 %v849_v46 }
 0x2d5   :  { %1404 = vmatmul.mubr.bf16.vlgmr.msra.gmra.mrb[8].mxu1 %v730_v44 }
 0x2d6   :  { %1428 = vmatpush3.bf16.msra.mxu1 %v1529_v61  ;;  %1443 = vmatprep.mubr.msk.bf16.mxu1 %vm1816_vm0, %v1815_v8 }
 0x2d7   :  { %1429 = vmatprep.subr.bf16.mxu1 %v1815_v8 }
 0x2da   :  { %1430 = vmatpush3.bf16.msra.mxu1 %v1530_v62 }
 0x2db   :  { %1431 = vmatprep.subr.bf16.mxu1 %v1815_v8 }
 0x2de   :  { %1432 = vmatpush3.bf16.msra.mxu1 %v1531_v63 }
 0x2df   :  { %1433 = vmatprep.subr.bf16.mxu1 %v1815_v8 }
 0x2e2   :  { %1434 = vmatpush3.bf16.msra.mxu1 %v1532_v0 }
 0x2e3   :  { %1435 = vmatprep.subr.bf16.mxu1 %v1815_v8 }
 0x2e6   :  { %1436 = vmatpush3.bf16.msra.mxu1 %v1533_v1 }
 0x2e7   :  { %1437 = vmatprep.subr.bf16.mxu1 %v1815_v8 }
 0x2ea   :  { %1438 = vmatpush3.bf16.msra.mxu1 %v1534_v4 }
 0x2eb   :  { %1439 = vmatprep.subr.bf16.mxu1 %v1815_v8 }
 0x2ee   :  { %1440 = vmatpush3.bf16.msra.mxu1 %v1535_v5 }
 0x2ef   :  { %1441 = vmatprep.subr.bf16.mxu1 %v1815_v8 }
 0x2f2   :  { %1442 = vmatpush3.bf16.msra.mxu1 %v1536_v6 }
 0x2f3   :  { %1447 = vmatprep.subr.msk.mxu1 %vm399_vm1, %v1086_v7 }
 0x2f5   :  { %1444 = vmatmul.mubr.bf16.vlgmr.msra.gmra.mrb[12].mxu1 %v968_v45 }
 0x2f6   :  { %1448 = vmatpush3.msk.msra.mxu1 %vm399_vm1, %v1086_v7  ;;  %1449 = vmatprep.mubr.msk.f32.mxu1 %vm392_vm2, %v2015_v2 }
 0x2fd   :  { %1450 = vmatmul.mubr.msk.f32.vlgmr.msra.gmra.mrb[2].mxu1 %vm392_vm2, %v2017_v3 }
 0x387   :  { %v713_v9 = vpop.f32.mrb[8].mxu0 }
 0x388   :  { %v1385_v10 = vpop.f32.mrb[9].mxu0  ;;  %v624_v11 = vpop.f32.mrb[4].mxu1 }
 0x389   :  { %v714_v8 = vadd.f32 %v713_v9, %v624_v11  ;;  %v716_v12 = vpop.f32.mrb[10].mxu0  ;;  %v1365_v13 = vpop.f32.mrb[5].mxu1 }
 0x38a   :  { %v1386_v14 = vpop.f32.mrb[11].mxu0  ;;  %v627_v15 = vpop.f32.mrb[6].mxu1 }
 0x38b   :  { %v717_v16 = vadd.f32 %v716_v12, %v627_v15  ;;  %v1366_v17 = vpop.f32.mrb[7].mxu1 }
 0x3a7   :  { %v949_v18 = vpop.f32.mrb[12].mxu0 }
 0x3a8   :  { %v1425_v19 = vpop.f32.mrb[13].mxu0  ;;  %v830_v20 = vpop.f32.mrb[8].mxu1 }
 0x3a9   :  { %v837_v21 = vadd.f32 %v830_v20, %v714_v8  ;;  %v952_v22 = vpop.f32.mrb[14].mxu0  ;;  %v1405_v23 = vpop.f32.mrb[9].mxu1 }
 0x3aa   :  { %v1426_v2 = vpop.f32.mrb[15].mxu0  ;;  %v833_v24 = vpop.f32.mrb[10].mxu1 }
 0x3ab   :  { %v838_v25 = vadd.f32 %v833_v24, %v717_v16  ;;  %v1406_v3 = vpop.f32.mrb[11].mxu1  ;;  %v956_v26 = vadd.f32 %v949_v18, %v837_v21 }
 0x3ad   :  { %v957_v27 = vadd.f32 %v952_v22, %v838_v25 }
 0x3c8   :  { %v1068_v28 = vpop.f32.mrb[12].mxu1 }
 0x3c9   :  { %v1075_v29 = vadd.f32 %v1068_v28, %v956_v26  ;;  %v1445_v30 = vpop.f32.mrb[13].mxu1 }
 0x3ca   :  { %v1071_v31 = vpop.f32.mrb[14].mxu1 }
 0x3cb   :  { %v1076_v32 = vadd.f32 %v1071_v31, %v957_v27  ;;  %v1446_v33 = vpop.f32.mrb[15].mxu1  ;;  %v1084_v37 = vadd.f32 %v1247_v34, %v1075_v29 }
 0x3cd   :  { %v1085_v35 = vadd.f32 %v1247_v34, %v1076_v32 }
 0x3d0   :  { %v1451_v36 = vpop.f32.mrb[2].mxu1 }
 0x3d1   :  { %v1166_v38 = vadd.f32 %v1451_v36, %v1085_v35  ;;  %v1156_v39 = vpop.f32.mrb[3].mxu1 }
 0x3d2   :  { %v1165_v40 = vadd.f32 %v1156_v39, %v1084_v37 }
 0x3d3   :  { %1168 = vst.msk [vmem:[#allocation19 + $0x8] sm:$0xff] %vm210_vm3, %v1166_v38 }
 0x3d4   :  { %1167 = vst.msk [vmem:[#allocation19] sm:$0xff] %vm210_vm3, %v1165_v40 }
 0x3d5   :  { %1772 = shalt.err (!%p1769_p0)
}
 0x3d6   :  { %s1773_s28 = scalar_lea.hbm %s2157_s10, 256 }
 0x3d7   :  { %p1774_p1 = scmp.ne.s32.totalorder %s2157_s10, %s1773_s28  ;;  %p1777_p2 = scmp.lt.u32.totalorder %s1773_s28, %s2157_s10 }
 0x3d9   :  { %p1779_p3 = pnand %p1777_p2, %p1774_p1 }
 0x3db   :  { %1782 = shalt.err (!%p1779_p3)
}
 0x3dc   :  { %1180 = dma.vmem_to_hbm [thread:$0]  %s1175_s4, 256, %s2157_s10, [#allocation4], %s1798_s23, %s1798_s23, %s1799_s24  }
 0x3dd   :  { %1795 = dma.done.wait [#allocation4], 256  }
 0x3de   :  { %1796 = vsyncadd [#allocation4], 4294967040 }
 0x3df   :  { %1184 = vsyncpa [#allocation3], 1 }
 0x3e0   :  { %1185 = vsyncpa [#allocation6], 1 }
 0x3e1   :  { %1186 = vsyncpa [#allocation9], 1 }
 0x3e2   :  { %1187 = vsyncpa [#allocation12], 1 }
 0x3e3   :  { %1188 = vsyncpa [#allocation15], 1 }
 0x3e4   :  { %1189 = vsyncpa [#allocation18], 1 }
 0x3e5   :  { %1190 = vsyncpa [#allocation4], 1 }

</bundles_post_ra>
